<compile_context>
chip_gen: v7x
topology: tpu7x:2x2x1
jax: 0.10.0
libtpu: 0.0.40
codegen_flags: <defaults>
</compile_context>

<pallas_src>
import jax
import jax.numpy as jnp
from jax.experimental import pallas as pl
from jax.experimental.pallas import tpu as pltpu


def mish_kernel(x_ref, o_ref):
    x = x_ref[...].astype(jnp.float32)
    u = jnp.exp(-jnp.abs(x))          # single transcendental, u in (0, 1] -> no overflow
    u2 = u * u
    pos = x > 0.0
    numer = jnp.where(pos, 1.0 + 2.0 * u, u2 + 2.0 * u)
    denom = jnp.where(pos, 2.0 * u2 + 2.0 * u + 1.0, u2 + 2.0 * u + 2.0)
    y = x * (numer / denom)           # numer/denom == tanh(softplus(x))
    o_ref[...] = y.astype(o_ref.dtype)


def mish(x: jax.Array, *, target_block_bytes: int = 2 * 1024 * 1024) -> jax.Array:
    """Applies Mish elementwise to any shape via a lane-dense (rows, 128) slab."""
    orig_shape = x.shape
    orig_dtype = x.dtype
    n = x.size
    if n == 0:
        return x

    itemsize = jnp.dtype(orig_dtype).itemsize
    LANE, SUB = 128, 8
    align = LANE * SUB                              # minimal (8, 128) tile: 1024 elems
    rows = (pl.cdiv(n, align) * align) // LANE      # multiple of 8

    # rows-per-block targeting ~target_block_bytes (1-4 MiB sweet spot), multiple of 8
    max_rows = max(SUB, (target_block_bytes // (LANE * itemsize)) // SUB * SUB)
    if rows <= max_rows:
        block_rows = rows                           # single block == full array dims
    else:
        # largest multiple of 8 that divides rows and is <= max_rows (no extra padding)
        r8 = rows // SUB
        best, d = 1, 1
        while d * d <= r8:
            if r8 % d == 0:
                for c in (d, r8 // d):
                    if c * SUB <= max_rows and c > best:
                        best = c
            d += 1
        block_rows = best * SUB
        if block_rows * LANE * itemsize < (64 << 10):
            # pathological factorization: pay a <=1-block pad rather than tiny blocks
            block_rows = max_rows
            rows = pl.cdiv(rows, block_rows) * block_rows

    n_pad = rows * LANE
    x_flat = jnp.reshape(x, (-1,))
    if n_pad != n:                                  # usually a no-op for NCHW shapes
        x_flat = jnp.pad(x_flat, (0, n_pad - n))
    x2d = jnp.reshape(x_flat, (rows, LANE))

    grid = (rows // block_rows,)
    out2d = pl.pallas_call(
        mish_kernel,
        out_shape=jax.ShapeDtypeStruct((rows, LANE), orig_dtype),
        grid_spec=pltpu.PrefetchScalarGridSpec(
            num_scalar_prefetch=0,
            grid=grid,
            in_specs=[pl.BlockSpec((block_rows, LANE), lambda i: (i, 0))],
            out_specs=pl.BlockSpec((block_rows, LANE), lambda i: (i, 0)),
        ),
        compiler_params=pltpu.CompilerParams(
            # parallel so v7x can shard the grid across its 2 TensorCores
            dimension_semantics=("parallel",),
        ),
    )(x2d)

    out_flat = jnp.reshape(out2d, (-1,))
    if n_pad != n:
        out_flat = out_flat[:n]
    return jnp.reshape(out_flat, orig_shape)


def mish_ref(x):
    xf = x.astype(jnp.float32)
    sp = jnp.maximum(xf, 0.0) + jnp.log1p(jnp.exp(-jnp.abs(xf)))
    return (xf * jnp.tanh(sp)).astype(x.dtype)


if __name__ == "__main__":
    key = jax.random.PRNGKey(0)
    # NCHW input, same convention as the PyTorch module's typical usage
    x = jax.random.normal(key, (2, 4, 16, 16), dtype=jnp.float32)

    y = jax.block_until_ready(mish(x))
    y_ref = mish_ref(x)
    assert y.shape == x.shape and y.dtype == x.dtype
    assert jnp.allclose(y, y_ref, atol=1e-5, rtol=1e-5)

    # wide-range stability check of the single-exp rational form
    xw = jnp.linspace(-30.0, 30.0, 2 * 4 * 16 * 16, dtype=jnp.float32).reshape(2, 4, 16, 16)
    yw = jax.block_until_ready(mish(xw))
    assert jnp.allclose(yw, mish_ref(xw), atol=1e-5, rtol=1e-5)

    print("KERNEL_OK")
</pallas_src>

<mosaic_0001>
module attributes {stable_mosaic.version = 11 : i64} {
  func.func @mish_kernel(%arg0: i32, %arg1: memref<16x128xf32, #tpu.memory_space<vmem>>, %arg2: memref<16x128xf32, #tpu.memory_space<vmem>>) attributes {dimension_semantics = [#tpu.dimension_semantics<parallel>], iteration_bounds = array<i64: 1>, scalar_prefetch = 0 : i64, scratch_operands = 0 : i64, tpu.core_type = #tpu.core_type<tc>, window_params = [{transform_indices = @transform_0, window_bounds = array<i64: 16, 128>}, {transform_indices = @transform_1, window_bounds = array<i64: 16, 128>}]} {
    %c0 = arith.constant 0 : index
    %c0_0 = arith.constant 0 : index
    %0 = vector.load %arg1[%c0, %c0_0] : memref<16x128xf32, #tpu.memory_space<vmem>>, vector<16x128xf32>
    %1 = math.absf %0 : vector<16x128xf32>
    %cst = arith.constant 0.000000e+00 : f32
    %2 = vector.broadcast %cst : f32 to vector<16x128xf32>
    %3 = arith.subf %2, %1 : vector<16x128xf32>
    %4 = math.exp %3 : vector<16x128xf32>
    %5 = arith.mulf %4, %4 : vector<16x128xf32>
    %cst_1 = arith.constant 0.000000e+00 : f32
    %6 = vector.broadcast %cst_1 : f32 to vector<16x128xf32>
    %7 = arith.cmpf ogt, %0, %6 : vector<16x128xf32>
    %cst_2 = arith.constant 2.000000e+00 : f32
    %8 = vector.broadcast %cst_2 : f32 to vector<16x128xf32>
    %9 = arith.mulf %8, %4 : vector<16x128xf32>
    %cst_3 = arith.constant 1.000000e+00 : f32
    %10 = vector.broadcast %cst_3 : f32 to vector<16x128xf32>
    %11 = arith.addf %10, %9 : vector<16x128xf32>
    %cst_4 = arith.constant 2.000000e+00 : f32
    %12 = vector.broadcast %cst_4 : f32 to vector<16x128xf32>
    %13 = arith.mulf %12, %4 : vector<16x128xf32>
    %14 = arith.addf %5, %13 : vector<16x128xf32>
    %15 = arith.select %7, %11, %14 : vector<16x128xi1>, vector<16x128xf32>
    %cst_5 = arith.constant 2.000000e+00 : f32
    %16 = vector.broadcast %cst_5 : f32 to vector<16x128xf32>
    %17 = arith.mulf %16, %5 : vector<16x128xf32>
    %cst_6 = arith.constant 2.000000e+00 : f32
    %18 = vector.broadcast %cst_6 : f32 to vector<16x128xf32>
    %19 = arith.mulf %18, %4 : vector<16x128xf32>
    %20 = arith.addf %17, %19 : vector<16x128xf32>
    %cst_7 = arith.constant 1.000000e+00 : f32
    %21 = vector.broadcast %cst_7 : f32 to vector<16x128xf32>
    %22 = arith.addf %20, %21 : vector<16x128xf32>
    %cst_8 = arith.constant 2.000000e+00 : f32
    %23 = vector.broadcast %cst_8 : f32 to vector<16x128xf32>
    %24 = arith.mulf %23, %4 : vector<16x128xf32>
    %25 = arith.addf %5, %24 : vector<16x128xf32>
    %cst_9 = arith.constant 2.000000e+00 : f32
    %26 = vector.broadcast %cst_9 : f32 to vector<16x128xf32>
    %27 = arith.addf %25, %26 : vector<16x128xf32>
    %28 = arith.select %7, %22, %27 : vector<16x128xi1>, vector<16x128xf32>
    %29 = arith.divf %15, %28 : vector<16x128xf32>
    %30 = arith.mulf %0, %29 : vector<16x128xf32>
    %c0_10 = arith.constant 0 : index
    %c0_11 = arith.constant 0 : index
    %31 = vector.load %arg2[%c0_10, %c0_11] : memref<16x128xf32, #tpu.memory_space<vmem>>, vector<16x128xf32>
    tpu.vector_store %arg2[%c0_10, %c0_11], %30 {strides = array<i32>} : memref<16x128xf32, #tpu.memory_space<vmem>>, vector<16x128xf32>,
    return
  }
  func.func @transform_0(%arg0: i32) -> (i32, i32) {
    %c0_i32 = arith.constant 0 : i32
    %c0_i32_0 = arith.constant 0 : i32
    return %arg0, %c0_i32 : i32, i32
  }
  func.func @transform_1(%arg0: i32) -> (i32, i32) {
    %c0_i32 = arith.constant 0 : i32
    %c0_i32_0 = arith.constant 0 : i32
    return %arg0, %c0_i32 : i32, i32
  }
}

</mosaic_0001>

<bundles_post_ra>
// kernel: tpu_custom_call.1
= control target key start
LH: loop header
LB: loop body
LE: loop exit
PB: predicated region body
PF: predicated region fallthrough
CT: control target
= control target key end

     0   :  { %6 = vsyncpa [#allocation3], 0  ;;  %s184_s0 = inlined_call_operand.hbm [shape: f32[16,128], index: 0, kind: input, shape index: {}]   ;;  %s185_s1 = inlined_call_operand.hbm [shape: f32[16,128], index: 1, kind: output, shape index: {}]  }
   0x1   :  { %7 = vsyncpa [#allocation4], 0  ;;  %s140_s6 = smov [#allocation2]   ;;  %s92_s10 = scalar_lea.hbm %s184_s0, 256 }
   0x2   :  { %s13_s7 = sshll.u32 %s140_s6, 4  ;;  %p93_p0 = scmp.ne.s32.totalorder %s184_s0, %s92_s10  ;;  %s14_s7 = int_to_ptr.vmem [resolvable:$true] %s13_s7 }
   0x3   :  { %p96_p1 = scmp.lt.u32.totalorder %s92_s10, %s184_s0 }
   0x5   :  { %p98_p2 = pnand %p96_p1, %p93_p0 }
   0x7   :  { %101 = shalt.err (!%p98_p2)
}
   0x8   :  { %s102_s15 = scalar_lea.vmem %s14_s7, 256  ;;  %p107_p4 = scmp.lt.s32.totalorder %s14_s7, %s14_s7 }
   0x9   :  { %p103_p3 = scmp.ne.s32.totalorder %s14_s7, %s102_s15  ;;  %p108_p5 = scmp.lt.s32.totalorder %s102_s15, %s102_s15 }
   0xb   :  { %p109_p6 = por %p108_p5, %p107_p4 }
   0xd   :  { %p110_p7 = pnand %p109_p6, %p103_p3 }
   0xf   :  { %113 = shalt.err (!%p110_p7)
}
  0x10   :  { %s141_s16 = smov 128   ;;  %s142_s17 = smov 8  }
  0x11   :  { %19 = dma.hbm_to_vmem [thread:$0]  %s184_s0, 256, %s14_s7, [#allocation3], %s141_s16, %s141_s16, %s142_s17  }
  0x12   :  { %136 = dma.done.wait [#allocation3], 256  }
  0x13   :  { %137 = vsyncadd [#allocation3], 4294967040  ;;  %v23_v0 = vld [vmem:[#allocation2] sm:$0xff]  ;;  %v24_v1 = vld [vmem:[#allocation2 + $0x8] sm:$0xff]  ;;  %s143_s0 = smov [#allocation5]  }
  0x14   :  { %v25_v2 = vand.u32 2147483647, %v23_v0  ;;  %v26_v3 = vand.u32 2147483647, %v24_v1  ;;  %vm35_vm0 = vcmp.gt.f32.partialorder %v23_v0, 0.0  ;;  %vm36_vm1 = vcmp.gt.f32.partialorder %v24_v1, 0.0 }
  0x15   :  { %s68_s20 = sshll.u32 %s143_s0, 4  ;;  %s69_s20 = int_to_ptr.vmem [resolvable:$true] %s68_s20 }
  0x16   :  { %v27_v4 = vsub.f32 0.0, %v25_v2  ;;  %v28_v5 = vsub.f32 0.0, %v26_v3  ;;  %s114_s21 = scalar_lea.vmem %s69_s20, 256  ;;  %p119_p9 = scmp.lt.s32.totalorder %s69_s20, %s69_s20 }
  0x17   :  { %p115_p8 = scmp.ne.s32.totalorder %s69_s20, %s114_s21  ;;  %p120_p10 = scmp.lt.s32.totalorder %s114_s21, %s114_s21 }
  0x18   :  { %v29_v6 = vmul.f32 1.442695, %v27_v4  ;;  %v31_v7 = vmul.f32 1.442695, %v28_v5 }
  0x19   :  { %p121_p11 = por %p120_p10, %p119_p9 }
  0x1a   :  { %84 = vpow2.f32 %v29_v6 }
  0x1b   :  { %86 = vpow2.f32 %v31_v7  ;;  %p122_p12 = pnand %p121_p11, %p115_p8 }
  0x24   :  { %v85_v8 = vpop.eup %84 }
  0x25   :  { %v87_v9 = vpop.eup %86  ;;  %v33_v10 = vmul.f32 %v85_v8, %v85_v8  ;;  %v37_v11 = vmul.f32 2.0, %v85_v8 }
  0x26   :  { %v34_v12 = vmul.f32 %v87_v9, %v87_v9  ;;  %v38_v13 = vmul.f32 2.0, %v87_v9 }
  0x27   :  { %v41_v14 = vadd.f32 %v37_v11, %v33_v10  ;;  %v45_v15 = vmul.f32 2.0, %v33_v10  ;;  %v39_v26 = vadd.f32 1.0, %v37_v11 }
  0x28   :  { %v42_v16 = vadd.f32 %v38_v13, %v34_v12  ;;  %v46_v17 = vmul.f32 2.0, %v34_v12  ;;  %v40_v27 = vadd.f32 1.0, %v38_v13 }
  0x29   :  { %v47_v18 = vadd.f32 %v45_v15, %v37_v11  ;;  %v51_v19 = vadd.f32 2.0, %v41_v14  ;;  %v43_v28 = vsel %vm35_vm0, %v39_v26, %v41_v14 }
  0x2a   :  { %v48_v20 = vadd.f32 %v46_v17, %v38_v13  ;;  %v52_v21 = vadd.f32 2.0, %v42_v16  ;;  %v44_v29 = vsel %vm36_vm1, %v40_v27, %v42_v16 }
  0x2b   :  { %v49_v22 = vadd.f32 1.0, %v47_v18 }
  0x2c   :  { %v50_v23 = vadd.f32 1.0, %v48_v20 }
  0x2d   :  { %v53_v24 = vsel %vm35_vm0, %v49_v22, %v51_v19 }
  0x2e   :  { %88 = vrcp.f32 %v53_v24  ;;  %v54_v25 = vsel %vm36_vm1, %v50_v23, %v52_v21 }
  0x2f   :  { %90 = vrcp.f32 %v54_v25 }
  0x38   :  { %v89_v30 = vpop.eup %88 }
  0x39   :  { %v91_v31 = vpop.eup %90  ;;  %v56_v32 = vmul.f32 %v89_v30, %v43_v28 }
  0x3a   :  { %v58_v33 = vmul.f32 %v91_v31, %v44_v29 }
  0x3b   :  { %v59_v34 = vmul.f32 %v56_v32, %v23_v0 }
  0x3c   :  { %v60_v35 = vmul.f32 %v58_v33, %v24_v1 }
  0x3d   :  { %61 = vst [vmem:[#allocation5] sm:$0xff] %v59_v34 }
  0x3e   :  { %62 = vst [vmem:[#allocation5 + $0x8] sm:$0xff] %v60_v35 }
  0x3f   :  { %125 = shalt.err (!%p122_p12)
}
  0x40   :  { %s126_s24 = scalar_lea.hbm %s185_s1, 256 }
  0x41   :  { %p127_p13 = scmp.ne.s32.totalorder %s185_s1, %s126_s24  ;;  %p130_p0 = scmp.lt.u32.totalorder %s126_s24, %s185_s1 }
  0x43   :  { %p132_p1 = pnand %p130_p0, %p127_p13 }
  0x45   :  { %135 = shalt.err (!%p132_p1)
}
  0x46   :  { %74 = dma.vmem_to_hbm [thread:$0]  %s69_s20, 256, %s185_s1, [#allocation4], %s141_s16, %s141_s16, %s142_s17  }
  0x47   :  { %138 = dma.done.wait [#allocation4], 256  }
  0x48   :  { %139 = vsyncadd [#allocation4], 4294967040 }
  0x49   :  { %78 = vsyncpa [#allocation3], 1 }
  0x4a   :  { %79 = vsyncpa [#allocation4], 1 }

</bundles_post_ra>
